<compile_context>
chip_gen: v5e
topology: v5e:2x2
jax: 0.10.0
libtpu: 0.0.40
codegen_flags: <defaults>
</compile_context>

<pallas_src>
import math

import jax
import jax.numpy as jnp
from jax.experimental import pallas as pl
from jax.experimental.pallas import tpu as pltpu


def flinear2d_fused_kernel(x_ref, w_ref, b_ref, o_ref):
    """One batch tile per grid step.

    x_ref : (B_tile, K)   K = C_in * S_in
    w_ref : (K, N)        N = C_out * S_out   (fused weight, grid-invariant)
    b_ref : (1, N)                              (fused bias, grid-invariant)
    o_ref : (B_tile, N)
    """
    acc = jnp.dot(x_ref[...], w_ref[...], preferred_element_type=jnp.float32)
    o_ref[...] = (acc + b_ref[...]).astype(o_ref.dtype)


def _round_up(a, m):
    return ((a + m - 1) // m) * m


def flinear2d_forward(x, w_u, b_u, w_v, b_v, in_shape, out_shape, *, b_tile=None):
    """x: (B, C_in, H_in, W_in) NCHW. Returns (B, C_out, H_out, W_out)."""
    B, C_in, H_in, W_in = x.shape
    S_in = in_shape[0] * in_shape[1]
    S_out = out_shape[0] * out_shape[1]
    assert H_in * W_in == S_in
    C_out = w_u.shape[0]
    K = C_in * S_in
    N = C_out * S_out

    # ---- wrapper-side weight fusion (layout plumbing, done once per call) ----
    wu3 = w_u.reshape(C_out, C_in, S_in)          # [o, c, s]
    wv3 = w_v.reshape(S_out, C_out, C_in)         # [t, o, c]
    # W_eff[c, s, o, t] = wu3[o, c, s] * wv3[t, o, c]  ->  (K, N) row-major
    w_eff = jnp.einsum("ocs,toc->csot", wu3, wv3).reshape(K, N).astype(x.dtype)
    # b_eff[o, t] = b_u[o] * sum_c wv3[t, o, c] + b_v[t]
    b_eff = (b_u[:, None] * jnp.sum(wv3, axis=2).T
             + b_v[None, :]).reshape(1, N).astype(jnp.float32)

    # ---- batch tiling: fold B into the MXU M dim, pad to sublane multiple ----
    if b_tile is None:
        b_tile = 256 if B >= 256 else _round_up(B, 8)
    B_pad = _round_up(B, b_tile)

    x_flat = x.reshape(B, K)
    if B_pad != B:
        x_flat = jnp.pad(x_flat, ((0, B_pad - B), (0, 0)))

    out_flat = pl.pallas_call(
        flinear2d_fused_kernel,
        out_shape=jax.ShapeDtypeStruct((B_pad, N), x.dtype),
        grid_spec=pltpu.PrefetchScalarGridSpec(
            num_scalar_prefetch=0,
            grid=(B_pad // b_tile,),
            in_specs=[
                pl.BlockSpec((b_tile, K), lambda b: (b, 0)),
                pl.BlockSpec((K, N), lambda b: (0, 0)),      # grid-invariant
                pl.BlockSpec((1, N), lambda b: (0, 0)),      # grid-invariant
            ],
            out_specs=pl.BlockSpec((b_tile, N), lambda b: (b, 0)),
        ),
        compiler_params=pltpu.CompilerParams(
            dimension_semantics=("parallel",)),
    )(x_flat, w_eff, b_eff)

    out_flat = out_flat[:B]
    return out_flat.reshape(B, C_out, out_shape[0], out_shape[1])


def flinear2d_reference(x, w_u, b_u, w_v, b_v, in_shape, out_shape):
    """Pure-JAX reference of the PyTorch forward (for validation)."""
    B, C_in = x.shape[0], x.shape[1]
    S_in = in_shape[0] * in_shape[1]
    S_out = out_shape[0] * out_shape[1]
    C_out = w_u.shape[0]
    xf = x.reshape(B, C_in, S_in)
    wu_t = w_u.reshape(C_out, C_in, S_in)              # [o, c, s]
    wv_t = w_v.reshape(S_out, C_out, C_in)             # [t, o, c]
    y1 = jnp.einsum("bcs,ocs->bco", xf, wu_t) + b_u    # (B, C_in, C_out)
    y2 = jnp.einsum("bco,toc->bot", y1, wv_t) + b_v    # (B, C_out, S_out)
    return y2.reshape(B, C_out, out_shape[0], out_shape[1])


if __name__ == "__main__":
    # Small shapes consistent with the module.
    B = 2
    in_channels = 4
    out_channels = 4
    in_shape = (16, 16)    # S_in = 256
    out_shape = (8, 8)     # S_out = 64
    S_in = in_shape[0] * in_shape[1]
    S_out = out_shape[0] * out_shape[1]

    key = jax.random.PRNGKey(0)
    k_x, k_wu, k_bu, k_wv, k_bv = jax.random.split(key, 5)

    x = jax.random.normal(k_x, (B, in_channels, in_shape[0], in_shape[1]),
                          dtype=jnp.float32)

    # Deterministic parameter init mirroring reset_parameters().
    bound_u = math.sqrt(3.0 / S_in)
    w_u = jax.random.uniform(k_wu, (out_channels, in_channels * S_in),
                             minval=-bound_u, maxval=bound_u,
                             dtype=jnp.float32)
    bb_u = 1.0 / math.sqrt(S_in)
    b_u = jax.random.uniform(k_bu, (out_channels,),
                             minval=-bb_u, maxval=bb_u, dtype=jnp.float32)

    bound_v = math.sqrt(3.0 / in_channels)
    w_v = jax.random.uniform(k_wv, (S_out, out_channels * in_channels),
                             minval=-bound_v, maxval=bound_v,
                             dtype=jnp.float32)
    bb_v = 1.0 / math.sqrt(in_channels)
    b_v = jax.random.uniform(k_bv, (S_out,),
                             minval=-bb_v, maxval=bb_v, dtype=jnp.float32)

    out = flinear2d_forward(x, w_u, b_u, w_v, b_v, in_shape, out_shape)
    out = jax.block_until_ready(out)

    ref = flinear2d_reference(x, w_u, b_u, w_v, b_v, in_shape, out_shape)
    assert out.shape == (B, out_channels, out_shape[0], out_shape[1]), out.shape
    assert jnp.allclose(out, ref, atol=1e-4, rtol=1e-4), \
        float(jnp.max(jnp.abs(out - ref)))

    print("KERNEL_OK")
</pallas_src>

<mosaic_0001>
module attributes {stable_mosaic.version = 11 : i64} {
  func.func @flinear2d_fused_kernel(%arg0: i32, %arg1: memref<8x1024xf32, #tpu.memory_space<vmem>>, %arg2: memref<1024x256xf32, #tpu.memory_space<vmem>>, %arg3: memref<1x256xf32, #tpu.memory_space<vmem>>, %arg4: memref<8x256xf32, #tpu.memory_space<vmem>>) attributes {dimension_semantics = [#tpu.dimension_semantics<parallel>], iteration_bounds = array<i64: 1>, scalar_prefetch = 0 : i64, scratch_operands = 0 : i64, tpu.core_type = #tpu.core_type<tc>, window_params = [{transform_indices = @transform_0, window_bounds = array<i64: 8, 1024>}, {pipeline_mode = #tpu.pipeline_mode<synchronous>, transform_indices = @transform_1, window_bounds = array<i64: 1024, 256>}, {pipeline_mode = #tpu.pipeline_mode<synchronous>, transform_indices = @transform_2, window_bounds = array<i64: 1, 256>}, {transform_indices = @transform_3, window_bounds = array<i64: 8, 256>}]} {
    %c0 = arith.constant 0 : index
    %c0_0 = arith.constant 0 : index
    %0 = vector.load %arg1[%c0, %c0_0] : memref<8x1024xf32, #tpu.memory_space<vmem>>, vector<8x1024xf32>
    %c0_1 = arith.constant 0 : index
    %c0_2 = arith.constant 0 : index
    %1 = vector.load %arg2[%c0_1, %c0_2] : memref<1024x256xf32, #tpu.memory_space<vmem>>, vector<1024x256xf32>
    %cst = arith.constant dense<0.000000e+00> : vector<8x256xf32>
    %2 = tpu.matmul %0, %1, %cst {dimension_numbers = #tpu.dot_dimension_numbers<[1], [0], [0], [1], [0, 0, 1, 1], [], []>} : vector<8x1024xf32>, vector<1024x256xf32>, vector<8x256xf32> -> vector<8x256xf32>
    %c0_3 = arith.constant 0 : index
    %c0_4 = arith.constant 0 : index
    %3 = vector.load %arg3[%c0_3, %c0_4] : memref<1x256xf32, #tpu.memory_space<vmem>>, vector<1x256xf32>
    %4 = vector.broadcast %3 : vector<1x256xf32> to vector<8x256xf32>
    %5 = arith.addf %2, %4 : vector<8x256xf32>
    %c0_5 = arith.constant 0 : index
    %c0_6 = arith.constant 0 : index
    %6 = vector.load %arg4[%c0_5, %c0_6] : memref<8x256xf32, #tpu.memory_space<vmem>>, vector<8x256xf32>
    tpu.vector_store %arg4[%c0_5, %c0_6], %5 {strides = array<i32>} : memref<8x256xf32, #tpu.memory_space<vmem>>, vector<8x256xf32>,
    return
  }
  func.func @transform_0(%arg0: i32) -> (i32, i32) {
    %c0_i32 = arith.constant 0 : i32
    %c0_i32_0 = arith.constant 0 : i32
    return %arg0, %c0_i32 : i32, i32
  }
  func.func @transform_1(%arg0: i32) -> (i32, i32) {
    %c0_i32 = arith.constant 0 : i32
    %c0_i32_0 = arith.constant 0 : i32
    %c0_i32_1 = arith.constant 0 : i32
    return %c0_i32, %c0_i32_0 : i32, i32
  }
  func.func @transform_2(%arg0: i32) -> (i32, i32) {
    %c0_i32 = arith.constant 0 : i32
    %c0_i32_0 = arith.constant 0 : i32
    %c0_i32_1 = arith.constant 0 : i32
    return %c0_i32, %c0_i32_0 : i32, i32
  }
  func.func @transform_3(%arg0: i32) -> (i32, i32) {
    %c0_i32 = arith.constant 0 : i32
    %c0_i32_0 = arith.constant 0 : i32
    return %arg0, %c0_i32 : i32, i32
  }
}

</mosaic_0001>

<bundles_post_ra>
// kernel: tpu_custom_call.1
= control target key start
LH: loop header
LB: loop body
LE: loop exit
PB: predicated region body
PF: predicated region fallthrough
CT: control target
= control target key end

     0   :  { %8 = vsyncpa [#allocation3], 0  ;;  %s846_s0 = inlined_call_operand.hbm [shape: f32[8,1024], index: 0, kind: input, shape index: {}]   ;;  %s847_s1 = inlined_call_operand.hbm [shape: f32[1024,256], index: 1, kind: input, shape index: {}]   ;;  %s848_s2 = inlined_call_operand.hbm [shape: f32[1,256], index: 2, kind: input, shape index: {}]   ;;  %s849_s3 = inlined_call_operand.hbm [shape: f32[8,256], index: 3, kind: output, shape index: {}]  }
   0x1   :  { %9 = vsyncpa [#allocation6], 0  ;;  %s26_s14 = sshll.u32 %s847_s1, 4  ;;  %s27_s14 = int_to_ptr.hbm [resolvable:$true] %s26_s14 }
   0x2   :  { %10 = vsyncpa [#allocation4], 0  ;;  %s776_s15 = smov [#allocation5]   ;;  %s16_s19 = sshll.u32 %s846_s0, 4  ;;  %s17_s19 = int_to_ptr.hbm [resolvable:$true] %s16_s19 }
   0x3   :  { %s28_s16 = sshll.u32 %s776_s15, 4  ;;  %s777_s20 = smov 256   ;;  %s29_s16 = int_to_ptr.vmem [resolvable:$true] %s28_s16 }
   0x4   :  { %s778_s21 = smov 16   ;;  %s779_s22 = smov [#allocation2]  }
   0x5   :  { %34 = dma.hbm_to_vmem [thread:$0]  %s27_s14, 32768, %s29_s16, [#allocation6], %s777_s20, %s777_s20, %s778_s21  }
   0x6   :  { %s18_s23 = sshll.u32 %s779_s22, 4  ;;  %s40_s26 = sshll.u32 %s848_s2, 4  ;;  %s19_s23 = int_to_ptr.vmem [resolvable:$true] %s18_s23  ;;  %s41_s26 = int_to_ptr.hbm [resolvable:$true] %s40_s26 }
   0x7   :  { %21 = dma.hbm_to_vmem [thread:$0]  %s17_s19, 1024, %s19_s23, [#allocation3]  }
   0x8   :  { %s780_s1 = smov [#allocation7]  }
   0x9   :  { %s42_s27 = sshll.u32 %s780_s1, 4  ;;  %s43_s27 = int_to_ptr.vmem [resolvable:$true] %s42_s27 }
   0xa   :  { %45 = dma.hbm_to_vmem [thread:$0]  %s41_s26, 32, %s43_s27, [#allocation6]  }
   0xb   :  { %770 = dma.done.wait [#allocation3], 1024  }
   0xc   :  { %771 = vsyncadd [#allocation3], 4294966272 }
   0xd   :  { %772 = dma.done.wait [#allocation6], 32800  }
   0xe   :  { %773 = vsyncadd [#allocation6], 4294934496  ;;  %v160_v0 = vld [vmem:[#allocation5 + $0x2f0] sm:$0xff]  ;;  %v158_v2 = vld [vmem:[#allocation5 + $0x2e0] sm:$0xff]  ;;  %s781_s0 = smov [#allocation8]   ;;  %s657_s30 = sshll.u32 %s849_s3, 4  ;;  %s658_s30 = int_to_ptr.hbm [resolvable:$true] %s657_s30 }
   0xf   :  { %v96_v1 = vld [vmem:[#allocation5 + $0xf0] sm:$0xff]  ;;  %368 = vmatpush.msra.mxu2 %v160_v0  ;;  %v94_v4 = vld [vmem:[#allocation5 + $0xe0] sm:$0xff]  ;;  %s655_s2 = sshll.u32 %s781_s0, 4  ;;  %s656_s2 = int_to_ptr.vmem [resolvable:$true] %s655_s2 }
  0x10   :  { %328 = vmatpush.msra.mxu0 %v96_v1  ;;  %v192_v3 = vld [vmem:[#allocation5 + $0x3f0] sm:$0xff]  ;;  %v190_v7 = vld [vmem:[#allocation5 + $0x3e0] sm:$0xff] }
  0x11   :  { %v128_v5 = vld [vmem:[#allocation5 + $0x1f0] sm:$0xff]  ;;  %388 = vmatpush.msra.mxu3 %v192_v3  ;;  %369 = vmatpush.msra.mxu2 %v158_v2  ;;  %v126_v9 = vld [vmem:[#allocation5 + $0x1e0] sm:$0xff] }
  0x12   :  { %348 = vmatpush.msra.mxu1 %v128_v5  ;;  %v156_v6 = vld [vmem:[#allocation5 + $0x2d0] sm:$0xff]  ;;  %329 = vmatpush.msra.mxu0 %v94_v4  ;;  %v154_v11 = vld [vmem:[#allocation5 + $0x2c0] sm:$0xff] }
  0x13   :  { %v92_v8 = vld [vmem:[#allocation5 + $0xd0] sm:$0xff]  ;;  %389 = vmatpush.msra.mxu3 %v190_v7  ;;  %v90_v12 = vld [vmem:[#allocation5 + $0xc0] sm:$0xff]  ;;  %370 = vmatpush.msra.mxu2 %v156_v6 }
  0x14   :  { %v188_v10 = vld [vmem:[#allocation5 + $0x3d0] sm:$0xff]  ;;  %349 = vmatpush.msra.mxu1 %v126_v9  ;;  %330 = vmatpush.msra.mxu0 %v92_v8  ;;  %v186_v14 = vld [vmem:[#allocation5 + $0x3c0] sm:$0xff] }
  0x15   :  { %v124_v13 = vld [vmem:[#allocation5 + $0x1d0] sm:$0xff]  ;;  %v122_v15 = vld [vmem:[#allocation5 + $0x1c0] sm:$0xff]  ;;  %390 = vmatpush.msra.mxu3 %v188_v10  ;;  %371 = vmatpush.msra.mxu2 %v154_v11 }
  0x16   :  { %350 = vmatpush.msra.mxu1 %v124_v13  ;;  %v152_v16 = vld [vmem:[#allocation5 + $0x2b0] sm:$0xff]  ;;  %331 = vmatpush.msra.mxu0 %v90_v12  ;;  %v150_v20 = vld [vmem:[#allocation5 + $0x2a0] sm:$0xff] }
  0x17   :  { %v88_v17 = vld [vmem:[#allocation5 + $0xb0] sm:$0xff]  ;;  %391 = vmatpush.msra.mxu3 %v186_v14  ;;  %v86_v21 = vld [vmem:[#allocation5 + $0xa0] sm:$0xff]  ;;  %372 = vmatpush.msra.mxu2 %v152_v16 }
  0x18   :  { %v184_v18 = vld [vmem:[#allocation5 + $0x3b0] sm:$0xff]  ;;  %351 = vmatpush.msra.mxu1 %v122_v15  ;;  %332 = vmatpush.msra.mxu0 %v88_v17  ;;  %v182_v22 = vld [vmem:[#allocation5 + $0x3a0] sm:$0xff] }
  0x19   :  { %v120_v19 = vld [vmem:[#allocation5 + $0x1b0] sm:$0xff]  ;;  %v118_v23 = vld [vmem:[#allocation5 + $0x1a0] sm:$0xff]  ;;  %392 = vmatpush.msra.mxu3 %v184_v18  ;;  %373 = vmatpush.msra.mxu2 %v150_v20 }
  0x1a   :  { %352 = vmatpush.msra.mxu1 %v120_v19  ;;  %v148_v24 = vld [vmem:[#allocation5 + $0x290] sm:$0xff]  ;;  %333 = vmatpush.msra.mxu0 %v86_v21  ;;  %v146_v28 = vld [vmem:[#allocation5 + $0x280] sm:$0xff] }
  0x1b   :  { %v84_v25 = vld [vmem:[#allocation5 + $0x90] sm:$0xff]  ;;  %393 = vmatpush.msra.mxu3 %v182_v22  ;;  %v82_v29 = vld [vmem:[#allocation5 + $0x80] sm:$0xff]  ;;  %374 = vmatpush.msra.mxu2 %v148_v24 }
  0x1c   :  { %v180_v26 = vld [vmem:[#allocation5 + $0x390] sm:$0xff]  ;;  %353 = vmatpush.msra.mxu1 %v118_v23  ;;  %334 = vmatpush.msra.mxu0 %v84_v25  ;;  %v178_v30 = vld [vmem:[#allocation5 + $0x380] sm:$0xff] }
  0x1d   :  { %v116_v27 = vld [vmem:[#allocation5 + $0x190] sm:$0xff]  ;;  %v114_v31 = vld [vmem:[#allocation5 + $0x180] sm:$0xff]  ;;  %394 = vmatpush.msra.mxu3 %v180_v26  ;;  %375 = vmatpush.msra.mxu2 %v146_v28 }
  0x1e   :  { %354 = vmatpush.msra.mxu1 %v116_v27  ;;  %v144_v32 = vld [vmem:[#allocation5 + $0x270] sm:$0xff]  ;;  %335 = vmatpush.msra.mxu0 %v82_v29  ;;  %v142_v36 = vld [vmem:[#allocation5 + $0x260] sm:$0xff] }
  0x1f   :  { %v80_v33 = vld [vmem:[#allocation5 + $0x70] sm:$0xff]  ;;  %395 = vmatpush.msra.mxu3 %v178_v30  ;;  %v78_v37 = vld [vmem:[#allocation5 + $0x60] sm:$0xff]  ;;  %376 = vmatpush.msra.mxu2 %v144_v32 }
  0x20   :  { %v176_v34 = vld [vmem:[#allocation5 + $0x370] sm:$0xff]  ;;  %355 = vmatpush.msra.mxu1 %v114_v31  ;;  %336 = vmatpush.msra.mxu0 %v80_v33  ;;  %v174_v38 = vld [vmem:[#allocation5 + $0x360] sm:$0xff] }
  0x21   :  { %v112_v35 = vld [vmem:[#allocation5 + $0x170] sm:$0xff]  ;;  %v110_v39 = vld [vmem:[#allocation5 + $0x160] sm:$0xff]  ;;  %396 = vmatpush.msra.mxu3 %v176_v34  ;;  %377 = vmatpush.msra.mxu2 %v142_v36 }
  0x22   :  { %356 = vmatpush.msra.mxu1 %v112_v35  ;;  %v140_v40 = vld [vmem:[#allocation5 + $0x250] sm:$0xff]  ;;  %337 = vmatpush.msra.mxu0 %v78_v37  ;;  %v138_v44 = vld [vmem:[#allocation5 + $0x240] sm:$0xff] }
  0x23   :  { %v76_v41 = vld [vmem:[#allocation5 + $0x50] sm:$0xff]  ;;  %397 = vmatpush.msra.mxu3 %v174_v38  ;;  %v74_v45 = vld [vmem:[#allocation5 + $0x40] sm:$0xff]  ;;  %378 = vmatpush.msra.mxu2 %v140_v40 }
  0x24   :  { %v172_v42 = vld [vmem:[#allocation5 + $0x350] sm:$0xff]  ;;  %357 = vmatpush.msra.mxu1 %v110_v39  ;;  %338 = vmatpush.msra.mxu0 %v76_v41  ;;  %v170_v46 = vld [vmem:[#allocation5 + $0x340] sm:$0xff] }
  0x25   :  { %v108_v43 = vld [vmem:[#allocation5 + $0x150] sm:$0xff]  ;;  %v106_v47 = vld [vmem:[#allocation5 + $0x140] sm:$0xff]  ;;  %398 = vmatpush.msra.mxu3 %v172_v42  ;;  %379 = vmatpush.msra.mxu2 %v138_v44 }
  0x26   :  { %358 = vmatpush.msra.mxu1 %v108_v43  ;;  %v136_v48 = vld [vmem:[#allocation5 + $0x230] sm:$0xff]  ;;  %339 = vmatpush.msra.mxu0 %v74_v45  ;;  %v134_v52 = vld [vmem:[#allocation5 + $0x220] sm:$0xff] }
  0x27   :  { %v72_v49 = vld [vmem:[#allocation5 + $0x30] sm:$0xff]  ;;  %399 = vmatpush.msra.mxu3 %v170_v46  ;;  %v70_v53 = vld [vmem:[#allocation5 + $0x20] sm:$0xff]  ;;  %380 = vmatpush.msra.mxu2 %v136_v48 }
  0x28   :  { %v168_v50 = vld [vmem:[#allocation5 + $0x330] sm:$0xff]  ;;  %359 = vmatpush.msra.mxu1 %v106_v47  ;;  %340 = vmatpush.msra.mxu0 %v72_v49  ;;  %v166_v54 = vld [vmem:[#allocation5 + $0x320] sm:$0xff] }
  0x29   :  { %v104_v51 = vld [vmem:[#allocation5 + $0x130] sm:$0xff]  ;;  %v102_v55 = vld [vmem:[#allocation5 + $0x120] sm:$0xff]  ;;  %400 = vmatpush.msra.mxu3 %v168_v50  ;;  %381 = vmatpush.msra.mxu2 %v134_v52 }
  0x2a   :  { %360 = vmatpush.msra.mxu1 %v104_v51  ;;  %v132_v56 = vld [vmem:[#allocation5 + $0x210] sm:$0xff]  ;;  %341 = vmatpush.msra.mxu0 %v70_v53  ;;  %v130_v60 = vld [vmem:[#allocation5 + $0x200] sm:$0xff] }
  0x2b   :  { %v68_v57 = vld [vmem:[#allocation5 + $0x10] sm:$0xff]  ;;  %401 = vmatpush.msra.mxu3 %v166_v54  ;;  %v66_v61 = vld [vmem:[#allocation5] sm:$0xff]  ;;  %382 = vmatpush.msra.mxu2 %v132_v56 }
  0x2c   :  { %v164_v58 = vld [vmem:[#allocation5 + $0x310] sm:$0xff]  ;;  %361 = vmatpush.msra.mxu1 %v102_v55  ;;  %342 = vmatpush.msra.mxu0 %v68_v57  ;;  %v162_v63 = vld [vmem:[#allocation5 + $0x300] sm:$0xff] }
  0x2d   :  { %v100_v59 = vld [vmem:[#allocation5 + $0x110] sm:$0xff]  ;;  %402 = vmatpush.msra.mxu3 %v164_v58  ;;  %383 = vmatpush.msra.mxu2 %v130_v60  ;;  %v286_v2 = vld [vmem:[#allocation5 + $0x6e0] sm:$0xff] }
  0x2e   :  { %v288_v62 = vld [vmem:[#allocation5 + $0x6f0] sm:$0xff]  ;;  %362 = vmatpush.msra.mxu1 %v100_v59  ;;  %343 = vmatpush.msra.mxu0 %v66_v61  ;;  %v98_v3 = vld [vmem:[#allocation5 + $0x100] sm:$0xff] }
  0x2f   :  { %v224_v0 = vld [vmem:[#allocation5 + $0x4f0] sm:$0xff]  ;;  %448 = vmatpush.msrb.mxu2 %v288_v62  ;;  %403 = vmatpush.msra.mxu3 %v162_v63  ;;  %v222_v4 = vld [vmem:[#allocation5 + $0x4e0] sm:$0xff]  ;;  %v161_v62 = vld [vmem:[#allocation5 + $0x2f8] sm:$0xff] }
  0x30   :  { %v320_v1 = vld [vmem:[#allocation5 + $0x7f0] sm:$0xff]  ;;  %408 = vmatpush.msrb.mxu0 %v224_v0  ;;  %v318_v7 = vld [vmem:[#allocation5 + $0x7e0] sm:$0xff]  ;;  %363 = vmatpush.msra.mxu1 %v98_v3  ;;  %v97_v3 = vld [vmem:[#allocation5 + $0xf8] sm:$0xff] }
  0x31   :  { %v256_v5 = vld [vmem:[#allocation5 + $0x5f0] sm:$0xff]  ;;  %468 = vmatpush.msrb.mxu3 %v320_v1  ;;  %449 = vmatpush.msrb.mxu2 %v286_v2  ;;  %v254_v9 = vld [vmem:[#allocation5 + $0x5e0] sm:$0xff]  ;;  %v816_v2 = vld [vmem:[#allocation2 + $0x18] sm:$0xff] }
  0x32   :  { %v284_v6 = vld [vmem:[#allocation5 + $0x6d0] sm:$0xff]  ;;  %409 = vmatpush.msrb.mxu0 %v222_v4  ;;  %428 = vmatpush.msrb.mxu1 %v256_v5  ;;  %v282_v10 = vld [vmem:[#allocation5 + $0x6c0] sm:$0xff]  ;;  %v159_v4 = vld [vmem:[#allocation5 + $0x2e8] sm:$0xff] }
  0x33   :  { %v220_v8 = vld [vmem:[#allocation5 + $0x4d0] sm:$0xff]  ;;  %450 = vmatpush.msrb.mxu2 %v284_v6  ;;  %469 = vmatpush.msrb.mxu3 %v318_v7  ;;  %v218_v12 = vld [vmem:[#allocation5 + $0x4c0] sm:$0xff]  ;;  %v193_v5 = vld [vmem:[#allocation5 + $0x3f8] sm:$0xff] }
  0x34   :  { %v316_v11 = vld [vmem:[#allocation5 + $0x7d0] sm:$0xff]  ;;  %410 = vmatpush.msrb.mxu0 %v220_v8  ;;  %429 = vmatpush.msrb.mxu1 %v254_v9  ;;  %v314_v15 = vld [vmem:[#allocation5 + $0x7c0] sm:$0xff]  ;;  %v95_v7 = vld [vmem:[#allocation5 + $0xe8] sm:$0xff] }
  0x35   :  { %v252_v13 = vld [vmem:[#allocation5 + $0x5d0] sm:$0xff]  ;;  %451 = vmatpush.msrb.mxu2 %v282_v10  ;;  %470 = vmatpush.msrb.mxu3 %v316_v11  ;;  %v250_v17 = vld [vmem:[#allocation5 + $0x5c0] sm:$0xff]  ;;  %v820_v8 = vld [vmem:[#allocation2 + $0x8] sm:$0xff] }
  0x36   :  { %v280_v14 = vld [vmem:[#allocation5 + $0x6b0] sm:$0xff]  ;;  %411 = vmatpush.msrb.mxu0 %v218_v12  ;;  %430 = vmatpush.msrb.mxu1 %v252_v13  ;;  %v278_v18 = vld [vmem:[#allocation5 + $0x6a0] sm:$0xff]  ;;  %v157_v9 = vld [vmem:[#allocation5 + $0x2d8] sm:$0xff] }
  0x37   :  { %v216_v16 = vld [vmem:[#allocation5 + $0x4b0] sm:$0xff]  ;;  %452 = vmatpush.msrb.mxu2 %v280_v14  ;;  %471 = vmatpush.msrb.mxu3 %v314_v15  ;;  %v214_v20 = vld [vmem:[#allocation5 + $0x4a0] sm:$0xff]  ;;  %v129_v10 = vld [vmem:[#allocation5 + $0x1f8] sm:$0xff] }
  0x38   :  { %v312_v19 = vld [vmem:[#allocation5 + $0x7b0] sm:$0xff]  ;;  %412 = vmatpush.msrb.mxu0 %v216_v16  ;;  %431 = vmatpush.msrb.mxu1 %v250_v17  ;;  %v310_v23 = vld [vmem:[#allocation5 + $0x7a0] sm:$0xff]  ;;  %v191_v11 = vld [vmem:[#allocation5 + $0x3e8] sm:$0xff] }
  0x39   :  { %v248_v21 = vld [vmem:[#allocation5 + $0x5b0] sm:$0xff]  ;;  %453 = vmatpush.msrb.mxu2 %v278_v18  ;;  %472 = vmatpush.msrb.mxu3 %v312_v19  ;;  %v246_v25 = vld [vmem:[#allocation5 + $0x5a0] sm:$0xff]  ;;  %v93_v12 = vld [vmem:[#allocation5 + $0xd8] sm:$0xff] }
  0x3a   :  { %v276_v22 = vld [vmem:[#allocation5 + $0x690] sm:$0xff]  ;;  %413 = vmatpush.msrb.mxu0 %v214_v20  ;;  %432 = vmatpush.msrb.mxu1 %v248_v21  ;;  %v274_v26 = vld [vmem:[#allocation5 + $0x680] sm:$0xff]  ;;  %v155_v13 = vld [vmem:[#allocation5 + $0x2c8] sm:$0xff] }
  0x3b   :  { %v212_v24 = vld [vmem:[#allocation5 + $0x490] sm:$0xff]  ;;  %454 = vmatpush.msrb.mxu2 %v276_v22  ;;  %473 = vmatpush.msrb.mxu3 %v310_v23  ;;  %v210_v28 = vld [vmem:[#allocation5 + $0x480] sm:$0xff]  ;;  %v127_v14 = vld [vmem:[#allocation5 + $0x1e8] sm:$0xff] }
  0x3c   :  { %v308_v27 = vld [vmem:[#allocation5 + $0x790] sm:$0xff]  ;;  %414 = vmatpush.msrb.mxu0 %v212_v24  ;;  %433 = vmatpush.msrb.mxu1 %v246_v25  ;;  %v306_v31 = vld [vmem:[#allocation5 + $0x780] sm:$0xff]  ;;  %v189_v15 = vld [vmem:[#allocation5 + $0x3d8] sm:$0xff] }
  0x3d   :  { %v244_v29 = vld [vmem:[#allocation5 + $0x590] sm:$0xff]  ;;  %455 = vmatpush.msrb.mxu2 %v274_v26  ;;  %474 = vmatpush.msrb.mxu3 %v308_v27  ;;  %v242_v33 = vld [vmem:[#allocation5 + $0x580] sm:$0xff]  ;;  %v91_v17 = vld [vmem:[#allocation5 + $0xc8] sm:$0xff] }
  0x3e   :  { %v272_v30 = vld [vmem:[#allocation5 + $0x670] sm:$0xff]  ;;  %415 = vmatpush.msrb.mxu0 %v210_v28  ;;  %434 = vmatpush.msrb.mxu1 %v244_v29  ;;  %v270_v34 = vld [vmem:[#allocation5 + $0x660] sm:$0xff]  ;;  %v125_v18 = vld [vmem:[#allocation5 + $0x1d8] sm:$0xff] }
  0x3f   :  { %v208_v32 = vld [vmem:[#allocation5 + $0x470] sm:$0xff]  ;;  %456 = vmatpush.msrb.mxu2 %v272_v30  ;;  %475 = vmatpush.msrb.mxu3 %v306_v31  ;;  %v206_v36 = vld [vmem:[#allocation5 + $0x460] sm:$0xff]  ;;  %v153_v19 = vld [vmem:[#allocation5 + $0x2b8] sm:$0xff] }
  0x40   :  { %v304_v35 = vld [vmem:[#allocation5 + $0x770] sm:$0xff]  ;;  %416 = vmatpush.msrb.mxu0 %v208_v32  ;;  %435 = vmatpush.msrb.mxu1 %v242_v33  ;;  %v302_v39 = vld [vmem:[#allocation5 + $0x760] sm:$0xff]  ;;  %v187_v20 = vld [vmem:[#allocation5 + $0x3c8] sm:$0xff] }
  0x41   :  { %v240_v37 = vld [vmem:[#allocation5 + $0x570] sm:$0xff]  ;;  %457 = vmatpush.msrb.mxu2 %v270_v34  ;;  %476 = vmatpush.msrb.mxu3 %v304_v35  ;;  %v238_v41 = vld [vmem:[#allocation5 + $0x560] sm:$0xff]  ;;  %v828_v22 = vld [vmem:[#allocation2 + $0x38] sm:$0xff] }
  0x42   :  { %v268_v38 = vld [vmem:[#allocation5 + $0x650] sm:$0xff]  ;;  %417 = vmatpush.msrb.mxu0 %v206_v36  ;;  %436 = vmatpush.msrb.mxu1 %v240_v37  ;;  %v266_v42 = vld [vmem:[#allocation5 + $0x640] sm:$0xff]  ;;  %v89_v23 = vld [vmem:[#allocation5 + $0xb8] sm:$0xff] }
  0x43   :  { %v204_v40 = vld [vmem:[#allocation5 + $0x450] sm:$0xff]  ;;  %458 = vmatpush.msrb.mxu2 %v268_v38  ;;  %477 = vmatpush.msrb.mxu3 %v302_v39  ;;  %v202_v44 = vld [vmem:[#allocation5 + $0x440] sm:$0xff]  ;;  %v123_v24 = vld [vmem:[#allocation5 + $0x1c8] sm:$0xff] }
  0x44   :  { %v300_v43 = vld [vmem:[#allocation5 + $0x750] sm:$0xff]  ;;  %418 = vmatpush.msrb.mxu0 %v204_v40  ;;  %437 = vmatpush.msrb.mxu1 %v238_v41  ;;  %v298_v47 = vld [vmem:[#allocation5 + $0x740] sm:$0xff]  ;;  %v151_v25 = vld [vmem:[#allocation5 + $0x2a8] sm:$0xff] }
  0x45   :  { %v236_v45 = vld [vmem:[#allocation5 + $0x550] sm:$0xff]  ;;  %459 = vmatpush.msrb.mxu2 %v266_v42  ;;  %478 = vmatpush.msrb.mxu3 %v300_v43  ;;  %v234_v49 = vld [vmem:[#allocation5 + $0x540] sm:$0xff]  ;;  %v185_v26 = vld [vmem:[#allocation5 + $0x3b8] sm:$0xff] }
  0x46   :  { %v264_v46 = vld [vmem:[#allocation5 + $0x630] sm:$0xff]  ;;  %419 = vmatpush.msrb.mxu0 %v202_v44  ;;  %438 = vmatpush.msrb.mxu1 %v236_v45  ;;  %v262_v50 = vld [vmem:[#allocation5 + $0x620] sm:$0xff]  ;;  %v831_v27 = vld [vmem:[#allocation2 + $0x28] sm:$0xff] }
  0x47   :  { %v200_v48 = vld [vmem:[#allocation5 + $0x430] sm:$0xff]  ;;  %460 = vmatpush.msrb.mxu2 %v264_v46  ;;  %479 = vmatpush.msrb.mxu3 %v298_v47  ;;  %v198_v52 = vld [vmem:[#allocation5 + $0x420] sm:$0xff]  ;;  %v87_v28 = vld [vmem:[#allocation5 + $0xa8] sm:$0xff] }
  0x48   :  { %v296_v51 = vld [vmem:[#allocation5 + $0x730] sm:$0xff]  ;;  %420 = vmatpush.msrb.mxu0 %v200_v48  ;;  %439 = vmatpush.msrb.mxu1 %v234_v49  ;;  %v294_v55 = vld [vmem:[#allocation5 + $0x720] sm:$0xff]  ;;  %v121_v29 = vld [vmem:[#allocation5 + $0x1b8] sm:$0xff] }
  0x49   :  { %v232_v53 = vld [vmem:[#allocation5 + $0x530] sm:$0xff]  ;;  %461 = vmatpush.msrb.mxu2 %v262_v50  ;;  %480 = vmatpush.msrb.mxu3 %v296_v51  ;;  %v230_v57 = vld [vmem:[#allocation5 + $0x520] sm:$0xff]  ;;  %v149_v30 = vld [vmem:[#allocation5 + $0x298] sm:$0xff] }
  0x4a   :  { %v260_v54 = vld [vmem:[#allocation5 + $0x610] sm:$0xff]  ;;  %421 = vmatpush.msrb.mxu0 %v198_v52  ;;  %440 = vmatpush.msrb.mxu1 %v232_v53  ;;  %v258_v58 = vld [vmem:[#allocation5 + $0x600] sm:$0xff]  ;;  %v183_v31 = vld [vmem:[#allocation5 + $0x3a8] sm:$0xff] }
  0x4b   :  { %v196_v56 = vld [vmem:[#allocation5 + $0x410] sm:$0xff]  ;;  %462 = vmatpush.msrb.mxu2 %v260_v54  ;;  %481 = vmatpush.msrb.mxu3 %v294_v55  ;;  %v194_v61 = vld [vmem:[#allocation5 + $0x400] sm:$0xff]  ;;  %v85_v32 = vld [vmem:[#allocation5 + $0x98] sm:$0xff] }
  0x4c   :  { %v292_v59 = vld [vmem:[#allocation5 + $0x710] sm:$0xff]  ;;  %422 = vmatpush.msrb.mxu0 %v196_v56  ;;  %441 = vmatpush.msrb.mxu1 %v230_v57  ;;  %v290_v0 = vld [vmem:[#allocation5 + $0x700] sm:$0xff]  ;;  %v119_v33 = vld [vmem:[#allocation5 + $0x1a8] sm:$0xff] }
  0x4d   :  { %v811_v60 = vld [vmem:[#allocation2 + $0x10] sm:$0xff]  ;;  %463 = vmatpush.msrb.mxu2 %v258_v58  ;;  %482 = vmatpush.msrb.mxu3 %v292_v59  ;;  %v813_v1 = vld [vmem:[#allocation2] sm:$0xff]  ;;  %v147_v34 = vld [vmem:[#allocation5 + $0x288] sm:$0xff] }
  0x4e   :  { %v228_v63 = vld [vmem:[#allocation5 + $0x510] sm:$0xff]  ;;  %384 = vmatmul.f32.vlgmr.msra.gmra.mxu2 %v811_v60  ;;  %423 = vmatpush.msrb.mxu0 %v194_v61  ;;  %v226_v6 = vld [vmem:[#allocation5 + $0x500] sm:$0xff]  ;;  %v181_v35 = vld [vmem:[#allocation5 + $0x398] sm:$0xff] }
  0x4f   :  { %528 = vmatpush.msra.mxu2 %v161_v62  ;;  %442 = vmatpush.msrb.mxu1 %v228_v63  ;;  %v823_v16 = vld [vmem:[#allocation2 + $0x30] sm:$0xff]  ;;  %v825_v21 = vld [vmem:[#allocation2 + $0x20] sm:$0xff]  ;;  %v83_v36 = vld [vmem:[#allocation5 + $0x88] sm:$0xff] }
  0x50   :  { %483 = vmatpush.msrb.mxu3 %v290_v0  ;;  %344 = vmatmul.f32.vlgmr.msra.gmra.mxu0 %v813_v1  ;;  %v117_v37 = vld [vmem:[#allocation5 + $0x198] sm:$0xff]  ;;  %v179_v39 = vld [vmem:[#allocation5 + $0x388] sm:$0xff] }
  0x51   :  { %404 = vmatmul.f32.vlgmr.msra.gmra.mxu3 %v816_v2  ;;  %488 = vmatpush.msra.mxu0 %v97_v3  ;;  %v145_v38 = vld [vmem:[#allocation5 + $0x278] sm:$0xff]  ;;  %v115_v41 = vld [vmem:[#allocation5 + $0x188] sm:$0xff] }
  0x52   :  { %529 = vmatpush.msra.mxu2 %v159_v4  ;;  %548 = vmatpush.msra.mxu3 %v193_v5  ;;  %v81_v40 = vld [vmem:[#allocation5 + $0x78] sm:$0xff]  ;;  %v143_v42 = vld [vmem:[#allocation5 + $0x268] sm:$0xff] }
  0x53   :  { %443 = vmatpush.msrb.mxu1 %v226_v6  ;;  %489 = vmatpush.msra.mxu0 %v95_v7  ;;  %v177_v43 = vld [vmem:[#allocation5 + $0x378] sm:$0xff]  ;;  %v79_v44 = vld [vmem:[#allocation5 + $0x68] sm:$0xff] }
  0x54   :  { %364 = vmatmul.f32.vlgmr.msra.gmra.mxu1 %v820_v8  ;;  %530 = vmatpush.msra.mxu2 %v157_v9  ;;  %v113_v45 = vld [vmem:[#allocation5 + $0x178] sm:$0xff]  ;;  %v175_v47 = vld [vmem:[#allocation5 + $0x368] sm:$0xff] }
  0x55   :  { %508 = vmatpush.msra.mxu1 %v129_v10  ;;  %549 = vmatpush.msra.mxu3 %v191_v11  ;;  %v141_v46 = vld [vmem:[#allocation5 + $0x258] sm:$0xff]  ;;  %v111_v49 = vld [vmem:[#allocation5 + $0x168] sm:$0xff] }
  0x56   :  { %490 = vmatpush.msra.mxu0 %v93_v12  ;;  %531 = vmatpush.msra.mxu2 %v155_v13  ;;  %v77_v48 = vld [vmem:[#allocation5 + $0x58] sm:$0xff]  ;;  %v139_v50 = vld [vmem:[#allocation5 + $0x248] sm:$0xff] }
  0x57   :  { %509 = vmatpush.msra.mxu1 %v127_v14  ;;  %550 = vmatpush.msra.mxu3 %v189_v15  ;;  %v173_v51 = vld [vmem:[#allocation5 + $0x358] sm:$0xff]  ;;  %v75_v52 = vld [vmem:[#allocation5 + $0x48] sm:$0xff] }
  0x58   :  { %464 = vmatmul.f32.vlgmr.msrb.gmra.mxu2 %v823_v16  ;;  %491 = vmatpush.msra.mxu0 %v91_v17  ;;  %v109_v53 = vld [vmem:[#allocation5 + $0x158] sm:$0xff]  ;;  %v171_v55 = vld [vmem:[#allocation5 + $0x348] sm:$0xff] }
  0x59   :  { %510 = vmatpush.msra.mxu1 %v125_v18  ;;  %532 = vmatpush.msra.mxu2 %v153_v19  ;;  %v137_v54 = vld [vmem:[#allocation5 + $0x238] sm:$0xff]  ;;  %v107_v57 = vld [vmem:[#allocation5 + $0x148] sm:$0xff] }
  0x5a   :  { %551 = vmatpush.msra.mxu3 %v187_v20  ;;  %424 = vmatmul.f32.vlgmr.msrb.gmra.mxu0 %v825_v21  ;;  %v73_v56 = vld [vmem:[#allocation5 + $0x38] sm:$0xff]  ;;  %v135_v58 = vld [vmem:[#allocation5 + $0x228] sm:$0xff] }
  0x5b   :  { %484 = vmatmul.f32.vlgmr.msrb.gmra.mxu3 %v828_v22  ;;  %492 = vmatpush.msra.mxu0 %v89_v23  ;;  %v169_v59 = vld [vmem:[#allocation5 + $0x338] sm:$0xff]  ;;  %v71_v61 = vld [vmem:[#allocation5 + $0x28] sm:$0xff] }
  0x5c   :  { %511 = vmatpush.msra.mxu1 %v123_v24  ;;  %533 = vmatpush.msra.mxu2 %v151_v25  ;;  %v105_v62 = vld [vmem:[#allocation5 + $0x138] sm:$0xff]  ;;  %v167_v0 = vld [vmem:[#allocation5 + $0x328] sm:$0xff] }
  0x5d   :  { %552 = vmatpush.msra.mxu3 %v185_v26  ;;  %444 = vmatmul.f32.vlgmr.msrb.gmra.mxu1 %v831_v27  ;;  %v133_v63 = vld [vmem:[#allocation5 + $0x218] sm:$0xff]  ;;  %v103_v4 = vld [vmem:[#allocation5 + $0x128] sm:$0xff] }
  0x5e   :  { %493 = vmatpush.msra.mxu0 %v87_v28  ;;  %512 = vmatpush.msra.mxu1 %v121_v29  ;;  %v69_v3 = vld [vmem:[#allocation5 + $0x18] sm:$0xff]  ;;  %v131_v5 = vld [vmem:[#allocation5 + $0x208] sm:$0xff] }
  0x5f   :  { %534 = vmatpush.msra.mxu2 %v149_v30  ;;  %553 = vmatpush.msra.mxu3 %v183_v31  ;;  %v165_v6 = vld [vmem:[#allocation5 + $0x318] sm:$0xff]  ;;  %v67_v9 = vld [vmem:[#allocation5 + $0x8] sm:$0xff] }
  0x60   :  { %494 = vmatpush.msra.mxu0 %v85_v32  ;;  %513 = vmatpush.msra.mxu1 %v119_v33  ;;  %v289_v7 = vld [vmem:[#allocation5 + $0x6f8] sm:$0xff]  ;;  %v163_v11 = vld [vmem:[#allocation5 + $0x308] sm:$0xff] }
  0x61   :  { %535 = vmatpush.msra.mxu2 %v147_v34  ;;  %554 = vmatpush.msra.mxu3 %v181_v35  ;;  %v101_v10 = vld [vmem:[#allocation5 + $0x118] sm:$0xff]  ;;  %v287_v13 = vld [vmem:[#allocation5 + $0x6e8] sm:$0xff] }
  0x62   :  { %495 = vmatpush.msra.mxu0 %v83_v36  ;;  %514 = vmatpush.msra.mxu1 %v117_v37  ;;  %v225_v12 = vld [vmem:[#allocation5 + $0x4f8] sm:$0xff]  ;;  %v99_v15 = vld [vmem:[#allocation5 + $0x108] sm:$0xff] }
  0x63   :  { %536 = vmatpush.msra.mxu2 %v145_v38  ;;  %555 = vmatpush.msra.mxu3 %v179_v39  ;;  %v321_v14 = vld [vmem:[#allocation5 + $0x7f8] sm:$0xff]  ;;  %v223_v17 = vld [vmem:[#allocation5 + $0x4e8] sm:$0xff] }
  0x64   :  { %496 = vmatpush.msra.mxu0 %v81_v40  ;;  %515 = vmatpush.msra.mxu1 %v115_v41  ;;  %v257_v18 = vld [vmem:[#allocation5 + $0x5f8] sm:$0xff]  ;;  %v319_v20 = vld [vmem:[#allocation5 + $0x7e8] sm:$0xff] }
  0x65   :  { %537 = vmatpush.msra.mxu2 %v143_v42  ;;  %556 = vmatpush.msra.mxu3 %v177_v43  ;;  %v285_v19 = vld [vmem:[#allocation5 + $0x6d8] sm:$0xff]  ;;  %v255_v24 = vld [vmem:[#allocation5 + $0x5e8] sm:$0xff] }
  0x66   :  { %497 = vmatpush.msra.mxu0 %v79_v44  ;;  %516 = vmatpush.msra.mxu1 %v113_v45  ;;  %v221_v23 = vld [vmem:[#allocation5 + $0x4d8] sm:$0xff]  ;;  %v283_v25 = vld [vmem:[#allocation5 + $0x6c8] sm:$0xff] }
  0x67   :  { %538 = vmatpush.msra.mxu2 %v141_v46  ;;  %557 = vmatpush.msra.mxu3 %v175_v47  ;;  %v317_v26 = vld [vmem:[#allocation5 + $0x7d8] sm:$0xff]  ;;  %v219_v28 = vld [vmem:[#allocation5 + $0x4c8] sm:$0xff] }
  0x68   :  { %498 = vmatpush.msra.mxu0 %v77_v48  ;;  %517 = vmatpush.msra.mxu1 %v111_v49  ;;  %v253_v29 = vld [vmem:[#allocation5 + $0x5d8] sm:$0xff]  ;;  %v315_v31 = vld [vmem:[#allocation5 + $0x7c8] sm:$0xff] }
  0x69   :  { %539 = vmatpush.msra.mxu2 %v139_v50  ;;  %558 = vmatpush.msra.mxu3 %v173_v51  ;;  %v281_v30 = vld [vmem:[#allocation5 + $0x6b8] sm:$0xff]  ;;  %v251_v33 = vld [vmem:[#allocation5 + $0x5c8] sm:$0xff] }
  0x6a   :  { %499 = vmatpush.msra.mxu0 %v75_v52  ;;  %518 = vmatpush.msra.mxu1 %v109_v53  ;;  %v217_v32 = vld [vmem:[#allocation5 + $0x4b8] sm:$0xff]  ;;  %v279_v34 = vld [vmem:[#allocation5 + $0x6a8] sm:$0xff] }
  0x6b   :  { %540 = vmatpush.msra.mxu2 %v137_v54  ;;  %559 = vmatpush.msra.mxu3 %v171_v55  ;;  %v313_v35 = vld [vmem:[#allocation5 + $0x7b8] sm:$0xff]  ;;  %v215_v36 = vld [vmem:[#allocation5 + $0x4a8] sm:$0xff] }
  0x6c   :  { %500 = vmatpush.msra.mxu0 %v73_v56  ;;  %519 = vmatpush.msra.mxu1 %v107_v57  ;;  %v249_v37 = vld [vmem:[#allocation5 + $0x5b8] sm:$0xff]  ;;  %v311_v39 = vld [vmem:[#allocation5 + $0x7a8] sm:$0xff] }
  0x6d   :  { %541 = vmatpush.msra.mxu2 %v135_v58  ;;  %560 = vmatpush.msra.mxu3 %v169_v59  ;;  %v277_v38 = vld [vmem:[#allocation5 + $0x698] sm:$0xff]  ;;  %v247_v41 = vld [vmem:[#allocation5 + $0x5a8] sm:$0xff] }
  0x6e   :  { %501 = vmatpush.msra.mxu0 %v71_v61  ;;  %520 = vmatpush.msra.mxu1 %v105_v62  ;;  %v213_v40 = vld [vmem:[#allocation5 + $0x498] sm:$0xff]  ;;  %v275_v42 = vld [vmem:[#allocation5 + $0x688] sm:$0xff] }
  0x6f   :  { %542 = vmatpush.msra.mxu2 %v133_v63  ;;  %561 = vmatpush.msra.mxu3 %v167_v0  ;;  %v309_v43 = vld [vmem:[#allocation5 + $0x798] sm:$0xff]  ;;  %v211_v44 = vld [vmem:[#allocation5 + $0x488] sm:$0xff] }
  0x70   :  { %502 = vmatpush.msra.mxu0 %v69_v3  ;;  %521 = vmatpush.msra.mxu1 %v103_v4  ;;  %v245_v45 = vld [vmem:[#allocation5 + $0x598] sm:$0xff]  ;;  %v307_v47 = vld [vmem:[#allocation5 + $0x788] sm:$0xff] }
  0x71   :  { %543 = vmatpush.msra.mxu2 %v131_v5  ;;  %562 = vmatpush.msra.mxu3 %v165_v6  ;;  %v273_v46 = vld [vmem:[#allocation5 + $0x678] sm:$0xff]  ;;  %v243_v49 = vld [vmem:[#allocation5 + $0x588] sm:$0xff] }
  0x72   :  { %503 = vmatpush.msra.mxu0 %v67_v9  ;;  %522 = vmatpush.msra.mxu1 %v101_v10  ;;  %v209_v48 = vld [vmem:[#allocation5 + $0x478] sm:$0xff]  ;;  %v271_v50 = vld [vmem:[#allocation5 + $0x668] sm:$0xff] }
  0x73   :  { %608 = vmatpush.msrb.mxu2 %v289_v7  ;;  %563 = vmatpush.msra.mxu3 %v163_v11  ;;  %v305_v51 = vld [vmem:[#allocation5 + $0x778] sm:$0xff]  ;;  %v207_v52 = vld [vmem:[#allocation5 + $0x468] sm:$0xff] }
  0x74   :  { %568 = vmatpush.msrb.mxu0 %v225_v12  ;;  %523 = vmatpush.msra.mxu1 %v99_v15  ;;  %v241_v53 = vld [vmem:[#allocation5 + $0x578] sm:$0xff]  ;;  %v303_v55 = vld [vmem:[#allocation5 + $0x768] sm:$0xff] }
  0x75   :  { %609 = vmatpush.msrb.mxu2 %v287_v13  ;;  %628 = vmatpush.msrb.mxu3 %v321_v14  ;;  %v269_v54 = vld [vmem:[#allocation5 + $0x658] sm:$0xff]  ;;  %v239_v57 = vld [vmem:[#allocation5 + $0x568] sm:$0xff] }
  0x76   :  { %569 = vmatpush.msrb.mxu0 %v223_v17  ;;  %588 = vmatpush.msrb.mxu1 %v257_v18  ;;  %v205_v56 = vld [vmem:[#allocation5 + $0x458] sm:$0xff]  ;;  %v267_v58 = vld [vmem:[#allocation5 + $0x648] sm:$0xff] }
  0x77   :  { %610 = vmatpush.msrb.mxu2 %v285_v19  ;;  %629 = vmatpush.msrb.mxu3 %v319_v20  ;;  %v301_v59 = vld [vmem:[#allocation5 + $0x758] sm:$0xff]  ;;  %v203_v61 = vld [vmem:[#allocation5 + $0x448] sm:$0xff] }
  0x78   :  { %570 = vmatpush.msrb.mxu0 %v221_v23  ;;  %589 = vmatpush.msrb.mxu1 %v255_v24  ;;  %v237_v62 = vld [vmem:[#allocation5 + $0x558] sm:$0xff]  ;;  %v299_v0 = vld [vmem:[#allocation5 + $0x748] sm:$0xff] }
  0x79   :  { %611 = vmatpush.msrb.mxu2 %v283_v25  ;;  %630 = vmatpush.msrb.mxu3 %v317_v26  ;;  %v265_v63 = vld [vmem:[#allocation5 + $0x638] sm:$0xff]  ;;  %v235_v4 = vld [vmem:[#allocation5 + $0x548] sm:$0xff] }
  0x7a   :  { %571 = vmatpush.msrb.mxu0 %v219_v28  ;;  %590 = vmatpush.msrb.mxu1 %v253_v29  ;;  %v201_v3 = vld [vmem:[#allocation5 + $0x438] sm:$0xff]  ;;  %v263_v5 = vld [vmem:[#allocation5 + $0x628] sm:$0xff] }
  0x7b   :  { %612 = vmatpush.msrb.mxu2 %v281_v30  ;;  %631 = vmatpush.msrb.mxu3 %v315_v31  ;;  %v297_v6 = vld [vmem:[#allocation5 + $0x738] sm:$0xff]  ;;  %v199_v7 = vld [vmem:[#allocation5 + $0x428] sm:$0xff] }
  0x7c   :  { %572 = vmatpush.msrb.mxu0 %v217_v32  ;;  %591 = vmatpush.msrb.mxu1 %v251_v33  ;;  %v233_v9 = vld [vmem:[#allocation5 + $0x538] sm:$0xff]  ;;  %v295_v11 = vld [vmem:[#allocation5 + $0x728] sm:$0xff] }
  0x7d   :  { %613 = vmatpush.msrb.mxu2 %v279_v34  ;;  %632 = vmatpush.msrb.mxu3 %v313_v35  ;;  %v261_v10 = vld [vmem:[#allocation5 + $0x618] sm:$0xff]  ;;  %v231_v12 = vld [vmem:[#allocation5 + $0x528] sm:$0xff] }
  0x7e   :  { %573 = vmatpush.msrb.mxu0 %v215_v36  ;;  %592 = vmatpush.msrb.mxu1 %v249_v37  ;;  %v259_v13 = vld [vmem:[#allocation5 + $0x608] sm:$0xff]  ;;  %v293_v14 = vld [vmem:[#allocation5 + $0x718] sm:$0xff] }
  0x7f   :  { %614 = vmatpush.msrb.mxu2 %v277_v38  ;;  %633 = vmatpush.msrb.mxu3 %v311_v39  ;;  %v291_v15 = vld [vmem:[#allocation5 + $0x708] sm:$0xff] }
  0x80   :  { %574 = vmatpush.msrb.mxu0 %v213_v40  ;;  %593 = vmatpush.msrb.mxu1 %v247_v41  ;;  %v227_v17 = vld [vmem:[#allocation5 + $0x508] sm:$0xff] }
  0x81   :  { %615 = vmatpush.msrb.mxu2 %v275_v42  ;;  %634 = vmatpush.msrb.mxu3 %v309_v43 }
  0x82   :  { %575 = vmatpush.msrb.mxu0 %v211_v44  ;;  %594 = vmatpush.msrb.mxu1 %v245_v45 }
  0x83   :  { %616 = vmatpush.msrb.mxu2 %v273_v46  ;;  %635 = vmatpush.msrb.mxu3 %v307_v47 }
  0x84   :  { %576 = vmatpush.msrb.mxu0 %v209_v48  ;;  %595 = vmatpush.msrb.mxu1 %v243_v49 }
  0x85   :  { %617 = vmatpush.msrb.mxu2 %v271_v50  ;;  %636 = vmatpush.msrb.mxu3 %v305_v51 }
  0x86   :  { %577 = vmatpush.msrb.mxu0 %v207_v52  ;;  %596 = vmatpush.msrb.mxu1 %v241_v53 }
  0x87   :  { %618 = vmatpush.msrb.mxu2 %v269_v54  ;;  %637 = vmatpush.msrb.mxu3 %v303_v55 }
  0x88   :  { %578 = vmatpush.msrb.mxu0 %v205_v56  ;;  %597 = vmatpush.msrb.mxu1 %v239_v57 }
  0x89   :  { %619 = vmatpush.msrb.mxu2 %v267_v58  ;;  %638 = vmatpush.msrb.mxu3 %v301_v59 }
  0x8a   :  { %544 = vmatmul.f32.vlgmr.msra.gmra.mxu2 %v811_v60  ;;  %579 = vmatpush.msrb.mxu0 %v203_v61  ;;  %v197_v60 = vld [vmem:[#allocation5 + $0x418] sm:$0xff] }
  0x8b   :  { %598 = vmatpush.msrb.mxu1 %v237_v62  ;;  %620 = vmatpush.msrb.mxu2 %v265_v63 }
  0x8c   :  { %639 = vmatpush.msrb.mxu3 %v299_v0  ;;  %504 = vmatmul.f32.vlgmr.msra.gmra.mxu0 %v813_v1  ;;  %v195_v1 = vld [vmem:[#allocation5 + $0x408] sm:$0xff] }
  0x8d   :  { %564 = vmatmul.f32.vlgmr.msra.gmra.mxu3 %v816_v2  ;;  %580 = vmatpush.msrb.mxu0 %v201_v3  ;;  %v229_v2 = vld [vmem:[#allocation5 + $0x518] sm:$0xff] }
  0x8e   :  { %599 = vmatpush.msrb.mxu1 %v235_v4  ;;  %621 = vmatpush.msrb.mxu2 %v263_v5 }
  0x8f   :  { %640 = vmatpush.msrb.mxu3 %v297_v6  ;;  %524 = vmatmul.f32.vlgmr.msra.gmra.mxu1 %v820_v8  ;;  %v322_v8 = vld [vmem:[#allocation7] sm:$0x3] }
  0x90   :  { %581 = vmatpush.msrb.mxu0 %v199_v7  ;;  %600 = vmatpush.msrb.mxu1 %v233_v9  ;;  %v324_v18 = vperm.slane %v322_v8, 0 }
  0x91   :  { %622 = vmatpush.msrb.mxu2 %v261_v10  ;;  %641 = vmatpush.msrb.mxu3 %v295_v11 }
  0x92   :  { %582 = vmatpush.msrb.mxu0 %v197_v60  ;;  %601 = vmatpush.msrb.mxu1 %v231_v12 }
  0x93   :  { %623 = vmatpush.msrb.mxu2 %v259_v13  ;;  %642 = vmatpush.msrb.mxu3 %v293_v14 }
  0x94   :  { %624 = vmatmul.f32.vlgmr.msrb.gmra.mxu2 %v823_v16  ;;  %583 = vmatpush.msrb.mxu0 %v195_v1 }
  0x95   :  { %602 = vmatpush.msrb.mxu1 %v229_v2  ;;  %643 = vmatpush.msrb.mxu3 %v291_v15 }
  0x96   :  { %584 = vmatmul.f32.vlgmr.msrb.gmra.mxu0 %v825_v21  ;;  %644 = vmatmul.f32.vlgmr.msrb.gmra.mxu3 %v828_v22 }
  0x97   :  { %603 = vmatpush.msrb.mxu1 %v227_v17 }
  0x98   :  { %604 = vmatmul.f32.vlgmr.msrb.gmra.mxu1 %v831_v27  ;;  %v325_v27 = vperm.slane %v322_v8, 1 }
  0xcd   :  { %v345_v19 = vpop.f32.mrf.mxu0 }
  0xce   :  { %v346_v20 = vadd.f32 %v345_v19, %v324_v18 }
  0xd1   :  { %v365_v23 = vpop.f32.mrf.mxu1  ;;  %v385_v24 = vpop.f32.mrf.mxu2 }
  0xd2   :  { %v366_v25 = vadd.f32 %v365_v23, %v346_v20 }
  0xd4   :  { %v386_v26 = vadd.f32 %v385_v24, %v366_v25  ;;  %v405_v16 = vpop.f32.mrf.mxu3 }
  0xd6   :  { %v406_v28 = vadd.f32 %v405_v16, %v386_v26 }
  0xd7   :  { %v425_v29 = vpop.f32.mrf.mxu0 }
  0xd8   :  { %v426_v30 = vadd.f32 %v425_v29, %v406_v28 }
  0xda   :  { %v445_v31 = vpop.f32.mrf.mxu1 }
  0xdb   :  { %v446_v32 = vadd.f32 %v445_v31, %v426_v30  ;;  %v465_v21 = vpop.f32.mrf.mxu2 }
  0xdd   :  { %v466_v33 = vadd.f32 %v465_v21, %v446_v32 }
  0xde   :  { %v485_v22 = vpop.f32.mrf.mxu3 }
  0xdf   :  { %v486_v34 = vadd.f32 %v485_v22, %v466_v33 }
  0xe1   :  { %648 = vst [vmem:[#allocation8] sm:$0xff] %v486_v34 }
 0x109   :  { %v505_v35 = vpop.f32.mrf.mxu0 }
 0x10a   :  { %v506_v36 = vadd.f32 %v505_v35, %v325_v27 }
 0x10c   :  { %v525_v37 = vpop.f32.mrf.mxu1 }
 0x10d   :  { %v526_v38 = vadd.f32 %v525_v37, %v506_v36  ;;  %v545_v39 = vpop.f32.mrf.mxu2 }
 0x10f   :  { %v546_v40 = vadd.f32 %v545_v39, %v526_v38 }
 0x110   :  { %v565_v41 = vpop.f32.mrf.mxu3 }
 0x111   :  { %v566_v42 = vadd.f32 %v565_v41, %v546_v40 }
 0x113   :  { %v585_v43 = vpop.f32.mrf.mxu0 }
 0x114   :  { %v586_v44 = vadd.f32 %v585_v43, %v566_v42 }
 0x115   :  { %v605_v45 = vpop.f32.mrf.mxu1 }
 0x116   :  { %v606_v46 = vadd.f32 %v605_v45, %v586_v44 }
 0x117   :  { %v625_v47 = vpop.f32.mrf.mxu2 }
 0x118   :  { %v626_v48 = vadd.f32 %v625_v47, %v606_v46 }
 0x119   :  { %v645_v49 = vpop.f32.mrf.mxu3 }
 0x11a   :  { %v646_v50 = vadd.f32 %v645_v49, %v626_v48 }
 0x11c   :  { %649 = vst [vmem:[#allocation8 + $0x8] sm:$0xff] %v646_v50 }
 0x11d   :  { %660 = dma.vmem_to_hbm [thread:$0]  %s656_s2, 256, %s658_s30, [#allocation4]  }
 0x11e   :  { %774 = dma.done.wait [#allocation4], 256  }
 0x11f   :  { %775 = vsyncadd [#allocation4], 4294967040 }
 0x120   :  { %665 = vsyncpa [#allocation3], 1 }
 0x121   :  { %666 = vsyncpa [#allocation6], 1 }
 0x122   :  { %667 = vsyncpa [#allocation4], 1 }

</bundles_post_ra>
